<compile_context>
chip_gen: v7x
topology: tpu7x:2x2x1
jax: 0.10.0
libtpu: 0.0.40
codegen_flags: <defaults>
</compile_context>

<pallas_src>
import jax
import jax.numpy as jnp
import numpy as np
from jax.experimental import pallas as pl
from jax.experimental.pallas import tpu as pltpu


def _round_up(x: int, m: int) -> int:
    return ((x + m - 1) // m) * m


def _cdiv(a: int, b: int) -> int:
    return -(-a // b)


def qnetwork_kernel(x_ref, w1_ref, b1_ref, w2_ref, b2_ref, w3_ref, b3_ref, o_ref):
    # x is already bf16 (cast in the wrapper to halve input HBM bytes).
    # fc1 + ReLU (bf16 MXU matmul, f32 accumulate, f32 elementwise)
    h1 = jnp.dot(x_ref[...], w1_ref[...], preferred_element_type=jnp.float32)
    h1 = jnp.maximum(h1 + b1_ref[...], 0.0)
    # fc2 + ReLU
    h2 = jnp.dot(h1.astype(jnp.bfloat16), w2_ref[...],
                 preferred_element_type=jnp.float32)
    h2 = jnp.maximum(h2 + b2_ref[...], 0.0)
    # fc3 (Q-values, no activation; output lanes padded only to 8)
    q = jnp.dot(h2.astype(jnp.bfloat16), w3_ref[...],
                preferred_element_type=jnp.float32)
    o_ref[...] = (q + b3_ref[...]).astype(o_ref.dtype)


def _pick_block_b(B: int, max_tile: int = 2048) -> int:
    """Batch tile: <= max_tile rows, 8-sublane aligned, padding waste bounded,
    and >= 2 grid steps once B is large enough to feed both v7x TensorCores."""
    n_tiles = max(1, _cdiv(B, max_tile))
    if n_tiles == 1 and B >= 1024:
        n_tiles = 2
    return _round_up(_cdiv(B, n_tiles), 8)


def qnetwork_forward(state, params, *, block_b: int | None = None):
    """state: (B, state_size) float32. params: dict of w1,b1,w2,b2,w3,b3."""
    w1, b1 = params["w1"], params["b1"]
    w2, b2 = params["w2"], params["b2"]
    w3, b3 = params["w3"], params["b3"]

    B, S = state.shape
    F1 = w1.shape[1]
    F2 = w2.shape[1]
    A = w3.shape[1]

    # --- narrow HBM-facing output: pad action dim only to 8 rows of lanes ---
    # (the out block covers the full last axis, so a <128 last dim is legal;
    #  masked stores are cheap here since store slots have enormous slack)
    A_pad = _round_up(A, 8)
    if A_pad != A:
        w3p = jnp.pad(w3, ((0, 0), (0, A_pad - A)))
        b3p = jnp.pad(b3, ((0, 0), (0, A_pad - A)))
    else:
        w3p, b3p = w3, b3

    # --- batch tile selection (bounded padding waste, >=2 tiles when useful) ---
    if block_b is None:
        block_b = _pick_block_b(B)
    B_pad = _round_up(B, block_b)

    # --- stream bf16 activations (halves input DMA bytes, numerics unchanged) ---
    x = state.astype(jnp.bfloat16)
    if B_pad != B:
        x = jnp.pad(x, ((0, B_pad - B), (0, 0)))

    grid = (B_pad // block_b,)

    flops = 2 * B_pad * (S * F1 + F1 * F2 + F2 * A_pad)
    bytes_accessed = (
        B_pad * S * 2                              # bf16 activations in
        + (S * F1 + F1 * F2 + F2 * A_pad) * 2      # bf16 weights (resident)
        + (F1 + F2 + A_pad) * 4                    # f32 biases
        + B_pad * A_pad * 4                        # narrow f32 output
    )

    out = pl.pallas_call(
        qnetwork_kernel,
        out_shape=jax.ShapeDtypeStruct((B_pad, A_pad), jnp.float32),
        grid_spec=pltpu.PrefetchScalarGridSpec(
            num_scalar_prefetch=0,
            grid=grid,
            in_specs=[
                pl.BlockSpec((block_b, S), lambda i: (i, 0)),   # x tile streams
                pl.BlockSpec((S, F1), lambda i: (0, 0)),        # weights resident
                pl.BlockSpec((1, F1), lambda i: (0, 0)),
                pl.BlockSpec((F1, F2), lambda i: (0, 0)),
                pl.BlockSpec((1, F2), lambda i: (0, 0)),
                pl.BlockSpec((F2, A_pad), lambda i: (0, 0)),
                pl.BlockSpec((1, A_pad), lambda i: (0, 0)),
            ],
            out_specs=pl.BlockSpec((block_b, A_pad), lambda i: (i, 0)),
        ),
        compiler_params=pltpu.CompilerParams(
            dimension_semantics=("parallel",)),
        cost_estimate=pl.CostEstimate(
            flops=flops, transcendentals=0, bytes_accessed=bytes_accessed),
    )(x, w1, b1, w2, b2, w3p, b3p)

    return out[:B, :A]


def init_params(key, state_size, action_size, fc1_units=128, fc2_units=64):
    """Deterministic init mimicking nn.Linear's uniform(-1/sqrt(fan_in), +).

    Weights stored as (in_features, out_features) in bf16 (MXU-native);
    biases stay f32.
    """
    ks = jax.random.split(key, 6)

    def linear(kw, kb, fan_in, fan_out):
        bound = 1.0 / np.sqrt(fan_in)
        w = jax.random.uniform(kw, (fan_in, fan_out), jnp.float32, -bound, bound)
        b = jax.random.uniform(kb, (1, fan_out), jnp.float32, -bound, bound)
        return w.astype(jnp.bfloat16), b

    w1, b1 = linear(ks[0], ks[1], state_size, fc1_units)
    w2, b2 = linear(ks[2], ks[3], fc1_units, fc2_units)
    w3, b3 = linear(ks[4], ks[5], fc2_units, action_size)
    return {"w1": w1, "b1": b1, "w2": w2, "b2": b2, "w3": w3, "b3": b3}


def qnetwork_reference(state, p):
    """Pure-JAX reference mirroring the kernel math (bf16 MXU, f32 accumulate)."""
    def dense(x, w, b, relu):
        y = jnp.dot(x.astype(jnp.bfloat16), w,
                    preferred_element_type=jnp.float32) + b
        return jnp.maximum(y, 0.0) if relu else y

    h1 = dense(state, p["w1"], p["b1"], True)
    h2 = dense(h1, p["w2"], p["b2"], True)
    return dense(h2, p["w3"], p["b3"], False)


if __name__ == "__main__":
    key = jax.random.PRNGKey(0)
    k_params, k_state, k_state_big = jax.random.split(key, 3)

    state_size = 8
    action_size = 4
    params = init_params(k_params, state_size, action_size)

    # Small inference-style batch (single 8-row tile).
    state = jax.random.normal(k_state, (2, state_size), dtype=jnp.float32)
    q = jax.block_until_ready(qnetwork_forward(state, params))
    assert q.shape == (2, action_size)
    np.testing.assert_allclose(np.asarray(q),
                               np.asarray(qnetwork_reference(state, params)),
                               rtol=1e-4, atol=1e-4)

    # Training-style batch exercising the multi-tile grid + padding-bound path.
    state_big = jax.random.normal(k_state_big, (1030, state_size), dtype=jnp.float32)
    q_big = jax.block_until_ready(qnetwork_forward(state_big, params))
    assert q_big.shape == (1030, action_size)
    np.testing.assert_allclose(np.asarray(q_big),
                               np.asarray(qnetwork_reference(state_big, params)),
                               rtol=1e-4, atol=1e-4)

    print("KERNEL_OK")
</pallas_src>

<mosaic_0001>
module attributes {stable_mosaic.version = 11 : i64} {
  func.func @qnetwork_kernel(%arg0: i32, %arg1: memref<8x8xbf16, #tpu.memory_space<vmem>>, %arg2: memref<8x128xbf16, #tpu.memory_space<vmem>>, %arg3: memref<1x128xf32, #tpu.memory_space<vmem>>, %arg4: memref<128x64xbf16, #tpu.memory_space<vmem>>, %arg5: memref<1x64xf32, #tpu.memory_space<vmem>>, %arg6: memref<64x8xbf16, #tpu.memory_space<vmem>>, %arg7: memref<1x8xf32, #tpu.memory_space<vmem>>, %arg8: memref<8x8xf32, #tpu.memory_space<vmem>>) attributes {dimension_semantics = [#tpu.dimension_semantics<parallel>], iteration_bounds = array<i64: 1>, scalar_prefetch = 0 : i64, scratch_operands = 0 : i64, tpu.core_type = #tpu.core_type<tc>, window_params = [{transform_indices = @transform_0, window_bounds = array<i64: 8, 8>}, {pipeline_mode = #tpu.pipeline_mode<synchronous>, transform_indices = @transform_1, window_bounds = array<i64: 8, 128>}, {pipeline_mode = #tpu.pipeline_mode<synchronous>, transform_indices = @transform_2, window_bounds = array<i64: 1, 128>}, {pipeline_mode = #tpu.pipeline_mode<synchronous>, transform_indices = @transform_3, window_bounds = array<i64: 128, 64>}, {pipeline_mode = #tpu.pipeline_mode<synchronous>, transform_indices = @transform_4, window_bounds = array<i64: 1, 64>}, {pipeline_mode = #tpu.pipeline_mode<synchronous>, transform_indices = @transform_5, window_bounds = array<i64: 64, 8>}, {pipeline_mode = #tpu.pipeline_mode<synchronous>, transform_indices = @transform_6, window_bounds = array<i64: 1, 8>}, {transform_indices = @transform_7, window_bounds = array<i64: 8, 8>}]} {
    %c0 = arith.constant 0 : index
    %c0_0 = arith.constant 0 : index
    %0 = vector.load %arg1[%c0, %c0_0] : memref<8x8xbf16, #tpu.memory_space<vmem>>, vector<8x8xbf16>
    %c0_1 = arith.constant 0 : index
    %c0_2 = arith.constant 0 : index
    %1 = vector.load %arg2[%c0_1, %c0_2] : memref<8x128xbf16, #tpu.memory_space<vmem>>, vector<8x128xbf16>
    %cst = arith.constant dense<0.000000e+00> : vector<8x128xf32>
    %2 = tpu.matmul %0, %1, %cst {dimension_numbers = #tpu.dot_dimension_numbers<[1], [0], [0], [1], [0, 0, 1, 1], [], []>} : vector<8x8xbf16>, vector<8x128xbf16>, vector<8x128xf32> -> vector<8x128xf32>
    %c0_3 = arith.constant 0 : index
    %c0_4 = arith.constant 0 : index
    %3 = vector.load %arg3[%c0_3, %c0_4] : memref<1x128xf32, #tpu.memory_space<vmem>>, vector<1x128xf32>
    %4 = vector.broadcast %3 : vector<1x128xf32> to vector<8x128xf32>
    %5 = arith.addf %2, %4 : vector<8x128xf32>
    %cst_5 = arith.constant 0.000000e+00 : f32
    %6 = vector.broadcast %cst_5 : f32 to vector<8x128xf32>
    %7 = arith.maximumf %5, %6 : vector<8x128xf32>
    %8 = arith.truncf %7 : vector<8x128xf32> to vector<8x128xbf16>
    %c0_6 = arith.constant 0 : index
    %c0_7 = arith.constant 0 : index
    %9 = vector.load %arg4[%c0_6, %c0_7] : memref<128x64xbf16, #tpu.memory_space<vmem>>, vector<128x64xbf16>
    %cst_8 = arith.constant dense<0.000000e+00> : vector<8x64xf32>
    %10 = tpu.matmul %8, %9, %cst_8 {dimension_numbers = #tpu.dot_dimension_numbers<[1], [0], [0], [1], [0, 0, 1, 1], [], []>} : vector<8x128xbf16>, vector<128x64xbf16>, vector<8x64xf32> -> vector<8x64xf32>
    %c0_9 = arith.constant 0 : index
    %c0_10 = arith.constant 0 : index
    %11 = vector.load %arg5[%c0_9, %c0_10] : memref<1x64xf32, #tpu.memory_space<vmem>>, vector<1x64xf32>
    %12 = vector.broadcast %11 : vector<1x64xf32> to vector<8x64xf32>
    %13 = arith.addf %10, %12 : vector<8x64xf32>
    %cst_11 = arith.constant 0.000000e+00 : f32
    %14 = vector.broadcast %cst_11 : f32 to vector<8x64xf32>
    %15 = arith.maximumf %13, %14 : vector<8x64xf32>
    %16 = arith.truncf %15 : vector<8x64xf32> to vector<8x64xbf16>
    %c0_12 = arith.constant 0 : index
    %c0_13 = arith.constant 0 : index
    %17 = vector.load %arg6[%c0_12, %c0_13] : memref<64x8xbf16, #tpu.memory_space<vmem>>, vector<64x8xbf16>
    %cst_14 = arith.constant dense<0.000000e+00> : vector<8x8xf32>
    %18 = tpu.matmul %16, %17, %cst_14 {dimension_numbers = #tpu.dot_dimension_numbers<[1], [0], [0], [1], [0, 0, 1, 1], [], []>} : vector<8x64xbf16>, vector<64x8xbf16>, vector<8x8xf32> -> vector<8x8xf32>
    %c0_15 = arith.constant 0 : index
    %c0_16 = arith.constant 0 : index
    %19 = vector.load %arg7[%c0_15, %c0_16] : memref<1x8xf32, #tpu.memory_space<vmem>>, vector<1x8xf32>
    %20 = vector.broadcast %19 : vector<1x8xf32> to vector<8x8xf32>
    %21 = arith.addf %18, %20 : vector<8x8xf32>
    %c0_17 = arith.constant 0 : index
    %c0_18 = arith.constant 0 : index
    %22 = vector.load %arg8[%c0_17, %c0_18] : memref<8x8xf32, #tpu.memory_space<vmem>>, vector<8x8xf32>
    tpu.vector_store %arg8[%c0_17, %c0_18], %21 {strides = array<i32>} : memref<8x8xf32, #tpu.memory_space<vmem>>, vector<8x8xf32>,
    return
  }
  func.func @transform_0(%arg0: i32) -> (i32, i32) {
    %c0_i32 = arith.constant 0 : i32
    %c0_i32_0 = arith.constant 0 : i32
    return %arg0, %c0_i32 : i32, i32
  }
  func.func @transform_1(%arg0: i32) -> (i32, i32) {
    %c0_i32 = arith.constant 0 : i32
    %c0_i32_0 = arith.constant 0 : i32
    %c0_i32_1 = arith.constant 0 : i32
    return %c0_i32, %c0_i32_0 : i32, i32
  }
  func.func @transform_2(%arg0: i32) -> (i32, i32) {
    %c0_i32 = arith.constant 0 : i32
    %c0_i32_0 = arith.constant 0 : i32
    %c0_i32_1 = arith.constant 0 : i32
    return %c0_i32, %c0_i32_0 : i32, i32
  }
  func.func @transform_3(%arg0: i32) -> (i32, i32) {
    %c0_i32 = arith.constant 0 : i32
    %c0_i32_0 = arith.constant 0 : i32
    %c0_i32_1 = arith.constant 0 : i32
    return %c0_i32, %c0_i32_0 : i32, i32
  }
  func.func @transform_4(%arg0: i32) -> (i32, i32) {
    %c0_i32 = arith.constant 0 : i32
    %c0_i32_0 = arith.constant 0 : i32
    %c0_i32_1 = arith.constant 0 : i32
    return %c0_i32, %c0_i32_0 : i32, i32
  }
  func.func @transform_5(%arg0: i32) -> (i32, i32) {
    %c0_i32 = arith.constant 0 : i32
    %c0_i32_0 = arith.constant 0 : i32
    %c0_i32_1 = arith.constant 0 : i32
    return %c0_i32, %c0_i32_0 : i32, i32
  }
  func.func @transform_6(%arg0: i32) -> (i32, i32) {
    %c0_i32 = arith.constant 0 : i32
    %c0_i32_0 = arith.constant 0 : i32
    %c0_i32_1 = arith.constant 0 : i32
    return %c0_i32, %c0_i32_0 : i32, i32
  }
  func.func @transform_7(%arg0: i32) -> (i32, i32) {
    %c0_i32 = arith.constant 0 : i32
    %c0_i32_0 = arith.constant 0 : i32
    return %arg0, %c0_i32 : i32, i32
  }
}

</mosaic_0001>

<bundles_post_ra>
// kernel: tpu_custom_call.1
= control target key start
LH: loop header
LB: loop body
LE: loop exit
PB: predicated region body
PF: predicated region fallthrough
CT: control target
= control target key end

     0   :  { %vm41_vm0 = vcmask 1043456   ;;  %vm37_vm1 = vcmask 64512   ;;  %v408_v1 = vmov 0.0   ;;  %vm409_vm2 = vmmov 0   ;;  %s516_s0 = inlined_call_operand.vmem [shape: bf16[8,8], index: 0, kind: input, shape index: {}]   ;;  %s517_s1 = inlined_call_operand.vmem [shape: bf16[8,128], index: 1, kind: input, shape index: {}]   ;;  %s518_s2 = inlined_call_operand.vmem [shape: f32[1,128], index: 2, kind: input, shape index: {}]   ;;  %s519_s3 = inlined_call_operand.vmem [shape: bf16[128,64], index: 3, kind: input, shape index: {}]   ;;  %s520_s4 = inlined_call_operand.vmem [shape: f32[1,64], index: 4, kind: input, shape index: {}]   ;;  %s521_s5 = inlined_call_operand.vmem [shape: bf16[64,8], index: 5, kind: input, shape index: {}]   ;;  %s522_s6 = inlined_call_operand.vmem [shape: f32[1,8], index: 6, kind: input, shape index: {}]   ;;  %s523_s7 = inlined_call_operand.hbm [shape: f32[8,8], index: 7, kind: output, shape index: {}]  }
   0x1   :  { %v29_v0 = vld [vmem:[%s517_s1] sm:$0xf]  ;;  %331 = vmatprep.subr.bf16.mxu0 %v408_v1  ;;  %333 = vmatprep.mubr.msk.bf16.mxu0 %vm409_vm2, %v408_v1  ;;  %v373_v5 = vld [vmem:[%s519_s3 + $0x8] sm:$0xff]   ;;  %v374_v6 = vld [vmem:[%s519_s3 + $0x10] sm:$0xff]  }
   0x2   :  { %v43_v2 = vsel %vm41_vm0, %v29_v0, 0  ;;  %v28_v3 = vld [vmem:[%s516_s0] sm:$0xf]  ;;  %337 = vmatprep.subr.bf16.mxu1 %v408_v1  ;;  %353 = vmatprep.mubr.msk.bf16.mxu1 %vm409_vm2, %v408_v1  ;;  %v375_v7 = vld [vmem:[%s519_s3 + $0x18] sm:$0xff]  }
   0x3   :  { %v372_v4 = vld [vmem:[%s519_s3] sm:$0xff]   ;;  %332 = vmatpush3.bf16.msra.mxu0 %v43_v2 }
   0x4   :  { %338 = vmatpush3.bf16.msra.mxu1 %v372_v4  ;;  %357 = vmatprep.subr.bf16.mxu0 %v408_v1 }
   0x5   :  { %339 = vmatprep.subr.bf16.mxu1 %v408_v1 }
   0x6   :  { %334 = vmatmul.mubr.msk.bf16.vlgmr.msra.gmra.mrb[0].mxu0 %vm37_vm1, %v28_v3 }
   0x7   :  { %365 = vmatprep.mubr.msk.bf16.mxu0 %vm409_vm2, %v408_v1 }
   0x8   :  { %340 = vmatpush3.bf16.msra.mxu1 %v373_v5 }
   0x9   :  { %341 = vmatprep.subr.bf16.mxu1 %v408_v1 }
   0xc   :  { %342 = vmatpush3.bf16.msra.mxu1 %v374_v6 }
   0xd   :  { %12 = vsyncpa [#allocation3], 0  ;;  %343 = vmatprep.subr.bf16.mxu1 %v408_v1  ;;  %v376_v8 = vld [vmem:[%s519_s3 + $0x20] sm:$0xff]   ;;  %v377_v9 = vld [vmem:[%s519_s3 + $0x28] sm:$0xff]   ;;  %vm239_vm3 = vcmask 523264   ;;  %s410_s1 = smov [#allocation2]  }
   0xe   :  { %v378_v10 = vld [vmem:[%s519_s3 + $0x30] sm:$0xff]   ;;  %v379_v11 = vld [vmem:[%s519_s3 + $0x38] sm:$0xff]   ;;  %v380_v12 = vld [vmem:[%s521_s5] sm:$0xff]  }
   0xf   :  { %358 = vmatpush3.bf16.msra.mxu0 %v380_v12  ;;  %v381_v13 = vld [vmem:[%s521_s5 + $0x8] sm:$0xff]   ;;  %v298_v14 = vld [vmem:[%s518_s2] ss:$0 sm:$0xff]  ;;  %v382_v22 = vld [vmem:[%s521_s5 + $0x10] sm:$0xff]  }
  0x10   :  { %344 = vmatpush3.bf16.msra.mxu1 %v375_v7  ;;  %359 = vmatprep.subr.bf16.mxu0 %v408_v1  ;;  %v383_v23 = vld [vmem:[%s521_s5 + $0x18] sm:$0xff]   ;;  %v300_v24 = vld [vmem:[%s520_s4] ss:$0 sm:$0xff]  ;;  %s290_s5 = sshll.u32 %s410_s1, 4  ;;  %s291_s5 = int_to_ptr.vmem [resolvable:$true] %s290_s5 }
  0x11   :  { %345 = vmatprep.subr.bf16.mxu1 %v408_v1  ;;  %v309_v32 = vld [vmem:[%s522_s6] ss:$0 sm:$0xff]  ;;  %s384_s4 = scalar_lea.vmem %s291_s5, 128  ;;  %p389_p1 = scmp.lt.s32.totalorder %s291_s5, %s291_s5 }
  0x12   :  { %p385_p0 = scmp.ne.s32.totalorder %s291_s5, %s384_s4  ;;  %p390_p2 = scmp.lt.s32.totalorder %s384_s4, %s384_s4 }
  0x13   :  { %360 = vmatpush3.bf16.msra.mxu0 %v381_v13 }
  0x14   :  { %346 = vmatpush3.bf16.msra.mxu1 %v376_v8  ;;  %361 = vmatprep.subr.bf16.mxu0 %v408_v1  ;;  %p391_p3 = por %p390_p2, %p389_p1 }
  0x15   :  { %347 = vmatprep.subr.bf16.mxu1 %v408_v1 }
  0x16   :  { %p392_p4 = pnand %p391_p3, %p385_p0 }
  0x17   :  { %362 = vmatpush3.bf16.msra.mxu0 %v382_v22 }
  0x18   :  { %348 = vmatpush3.bf16.msra.mxu1 %v377_v9  ;;  %363 = vmatprep.subr.bf16.mxu0 %v408_v1 }
  0x19   :  { %349 = vmatprep.subr.bf16.mxu1 %v408_v1 }
  0x1b   :  { %364 = vmatpush3.bf16.msra.mxu0 %v383_v23 }
  0x1c   :  { %350 = vmatpush3.bf16.msra.mxu1 %v378_v10 }
  0x1d   :  { %351 = vmatprep.subr.bf16.mxu1 %v408_v1 }
  0x20   :  { %352 = vmatpush3.bf16.msra.mxu1 %v379_v11 }
  0xd9   :  { %v79_v15 = vpop.f32.mrb[0].mxu0 }
  0xda   :  { %v80_v16 = vadd.f32 %v298_v14, %v79_v15  ;;  %v335_v17 = vpop.f32.mrb[1].mxu0 }
  0xdb   :  { %v82_v18 = vpop.f32.mrb[2].mxu0 }
  0xdc   :  { %v85_v19 = vmax.f32 %v80_v16, 0.0  ;;  %v336_v20 = vpop.f32.mrb[3].mxu0 }
  0xde   :  { %v86_v21 = vpack.c.bf16 %v85_v19, %v85_v19 }
  0xe0   :  { %354 = vmatmul.mubr.bf16.vlgmr.msra.gmra.mrb[0].mxu1 %v86_v21 }
 0x1b3   :  { %v192_v25 = vpop.f32.mrb[0].mxu1 }
 0x1b4   :  { %v193_v26 = vadd.f32 %v300_v24, %v192_v25  ;;  %v355_v27 = vpop.f32.mrb[1].mxu1 }
 0x1b5   :  { %v195_v28 = vpop.f32.mrb[2].mxu1 }
 0x1b6   :  { %v198_v29 = vmax.f32 %v193_v26, 0.0  ;;  %v356_v30 = vpop.f32.mrb[3].mxu1 }
 0x1b8   :  { %v199_v31 = vpack.c.bf16 %v198_v29, %v198_v29 }
 0x1ba   :  { %366 = vmatmul.mubr.msk.bf16.vlgmr.msra.gmra.mrb[4].mxu0 %vm239_vm3, %v199_v31 }
 0x28d   :  { %v277_v33 = vpop.f32.mrb[4].mxu0 }
 0x28e   :  { %v278_v34 = vadd.f32 %v309_v32, %v277_v33  ;;  %v367_v35 = vpop.f32.mrb[5].mxu0 }
 0x28f   :  { %v280_v36 = vpop.f32.mrb[6].mxu0 }
 0x290   :  { %283 = vst.msk [vmem:[#allocation2] sm:$0xff] %vm37_vm1, %v278_v34  ;;  %v368_v37 = vpop.f32.mrb[7].mxu0 }
 0x291   :  { %395 = shalt.err (!%p392_p4)
}
 0x292   :  { %s396_s6 = scalar_lea.hbm %s523_s7, 128 }
 0x293   :  { %p397_p5 = scmp.ne.s32.totalorder %s523_s7, %s396_s6  ;;  %p400_p6 = scmp.lt.u32.totalorder %s396_s6, %s523_s7 }
 0x295   :  { %p402_p7 = pnand %p400_p6, %p397_p5 }
 0x297   :  { %405 = shalt.err (!%p402_p7)
}
 0x298   :  { %293 = dma.vmem_to_hbm [thread:$0]  %s291_s5, 128, %s523_s7, [#allocation3]  }
 0x299   :  { %406 = dma.done.wait [#allocation3], 128  }
 0x29a   :  { %407 = vsyncadd [#allocation3], 4294967168 }
 0x29b   :  { %297 = vsyncpa [#allocation3], 1 }

</bundles_post_ra>
